<compile_context>
chip_gen: v5e
topology: v5e:2x2
jax: 0.10.0
libtpu: 0.0.40
codegen_flags: <defaults>
</compile_context>

<pallas_src>
import functools
from typing import NamedTuple, Optional

import jax
import jax.numpy as jnp
from jax.experimental import pallas as pl
from jax.experimental.pallas import tpu as pltpu

_MiB = 1024 * 1024
_SQRT_2_OVER_PI = 0.7978845608028654


def _gelu_tanh(x):
    # torch.nn.functional.gelu(x, approximate="tanh") — Gemma's hidden act.
    return 0.5 * x * (1.0 + jnp.tanh(_SQRT_2_OVER_PI * (x + 0.044715 * (x * x * x))))


class TileConfig(NamedTuple):
    tile_rows: int
    tile_inter: int
    vmem_cap_bytes: int


class PreparedGemmaMLPWeights(NamedTuple):
    wgu: jax.Array   # (hidden, 2 * inter_pad): per-tile interleaved [gate | up]
    wd: jax.Array    # (inter_pad, hidden)
    tk: int          # intermediate tile width the wgu layout was built for


def _device_kind() -> str:
    try:
        return jax.devices()[0].device_kind.lower()
    except Exception:
        return ""


def select_tile_config(n_rows: Optional[int] = None) -> TileConfig:
    """Per-generation tile / VMEM-cap selection (see perf review)."""
    kind = _device_kind()
    is_v7 = ("v7" in kind) or ("tpu7" in kind) or ("7x" in kind)
    is_v6 = "v6" in kind
    is_v5 = "v5" in kind

    if is_v7:
        cfg = TileConfig(tile_rows=512, tile_inter=256, vmem_cap_bytes=48 * _MiB)
    elif is_v6:
        cfg = TileConfig(tile_rows=1024, tile_inter=256, vmem_cap_bytes=96 * _MiB)
    elif is_v5:
        cfg = TileConfig(tile_rows=512, tile_inter=256, vmem_cap_bytes=96 * _MiB)
    else:  # unknown / older parts: stay conservative
        cfg = TileConfig(tile_rows=512, tile_inter=256, vmem_cap_bytes=48 * _MiB)

    if n_rows is not None and n_rows <= 256:
        # Decode / small-batch regime is weight-HBM-bound: wider intermediate
        # tiles amortize the per-grid-step overhead.
        cfg = cfg._replace(tile_inter=512 if is_v7 else 1024)
    return cfg


def prepare_gemma_mlp_weights(gate_w, up_w, down_w, *, tile_inter=None, dtype=None):
    """One-time weight preparation (transpose + pad + gate/up fusion).

    Weights use PyTorch nn.Linear layout:
      gate_w, up_w: (inter, hidden);  down_w: (hidden, inter).
    Call this once at load time; the result is reused across gemma_mlp calls.
    """
    inter, hidden = gate_w.shape
    assert up_w.shape == (inter, hidden)
    assert down_w.shape == (hidden, inter)

    if tile_inter is None:
        tile_inter = select_tile_config().tile_inter
    if dtype is not None:
        gate_w = gate_w.astype(dtype)
        up_w = up_w.astype(dtype)
        down_w = down_w.astype(dtype)

    tk = min(tile_inter, inter)
    i_pad = pl.cdiv(inter, tk) * tk

    wg = gate_w.T            # (hidden, inter)
    wu = up_w.T              # (hidden, inter)
    wd = down_w.T            # (inter, hidden)
    if i_pad != inter:
        pad = i_pad - inter  # zero columns -> gate = 0 -> gelu(0)*up = 0 -> exact
        wg = jnp.pad(wg, ((0, 0), (0, pad)))
        wu = jnp.pad(wu, ((0, 0), (0, pad)))
        wd = jnp.pad(wd, ((0, pad), (0, 0)))

    n_k = i_pad // tk
    # Interleave gate/up per intermediate tile so block index k of a single
    # (hidden, 2*tk) BlockSpec covers exactly [gate tile k | up tile k]:
    wgu = jnp.stack([wg.reshape(hidden, n_k, tk), wu.reshape(hidden, n_k, tk)], axis=2)
    wgu = wgu.reshape(hidden, 2 * i_pad)
    return PreparedGemmaMLPWeights(wgu=wgu, wd=wd, tk=tk)


def _gemma_mlp_kernel(x_ref, wgu_ref, wd_ref, o_ref, *scratch, tk):
    # scratch = (acc_ref,) for non-f32 outputs; empty when accumulating
    # directly into the resident f32 output block.
    acc_ref = scratch[0] if scratch else o_ref
    k = pl.program_id(1)

    @pl.when(k == 0)
    def _init():
        acc_ref[...] = jnp.zeros_like(acc_ref)

    x = x_ref[...]                                                       # (TM, H)
    # Fused gate|up projection for this intermediate tile: one long MXU matmul.
    gu = jnp.dot(x, wgu_ref[...], preferred_element_type=jnp.float32)    # (TM, 2*TK)
    gate = gu[:, :tk]
    up = gu[:, tk:]
    h = (_gelu_tanh(gate) * up).astype(wd_ref.dtype)                     # (TM, TK)
    # Partial down projection, accumulated across intermediate tiles.
    acc_ref[...] += jnp.dot(h, wd_ref[...], preferred_element_type=jnp.float32)

    if scratch:
        @pl.when(k == pl.num_programs(1) - 1)
        def _finalize():
            o_ref[...] = acc_ref[...].astype(o_ref.dtype)


def _working_set_bytes(tm, tk, hidden, x_bytes, w_bytes, out_bytes, need_acc):
    ws = 2 * tm * hidden * x_bytes            # x tile (double-buffered)
    ws += 2 * hidden * (2 * tk) * w_bytes     # fused gate|up weight tile
    ws += 2 * tk * hidden * w_bytes           # down-proj weight tile
    ws += 2 * tm * hidden * out_bytes         # output tile
    if need_acc:
        ws += tm * hidden * 4                 # resident f32 accumulator
    return ws


def gemma_mlp(x, weights: PreparedGemmaMLPWeights, *, tile_rows=None,
              vmem_limit_bytes=None):
    """Fused Gemma MLP: down_proj( gelu_tanh(x @ gate^T) * (x @ up^T) )."""
    orig_shape = x.shape
    hidden = orig_shape[-1]
    wgu, wd, tk = weights
    i_pad = wd.shape[0]
    assert wgu.shape == (hidden, 2 * i_pad)
    assert wd.shape == (i_pad, hidden)
    assert i_pad % tk == 0

    x2d = x.reshape(-1, hidden)
    n_rows = x2d.shape[0]
    out_dtype = x.dtype
    need_acc = jnp.dtype(out_dtype) != jnp.dtype(jnp.float32)

    cfg = select_tile_config(n_rows)
    if tile_rows is None:
        tile_rows = cfg.tile_rows

    x_bytes = jnp.dtype(x2d.dtype).itemsize
    w_bytes = jnp.dtype(wgu.dtype).itemsize
    out_bytes = jnp.dtype(out_dtype).itemsize

    rows_rounded = ((n_rows + 7) // 8) * 8
    tm = max(8, min(tile_rows, rows_rounded))
    # Shrink the row tile if the working set would overflow the per-generation
    # VMEM cap (e.g. f32 inputs or very large hidden on v7x).
    while tm > 256 and _working_set_bytes(tm, tk, hidden, x_bytes, w_bytes,
                                          out_bytes, need_acc) > int(0.8 * cfg.vmem_cap_bytes):
        tm = max(256, tm // 2)

    ws = _working_set_bytes(tm, tk, hidden, x_bytes, w_bytes, out_bytes, need_acc)
    if vmem_limit_bytes is None:
        # Size the scoped limit from the actual buffer budget (+ headroom for
        # Mosaic internal scratch), clamped per generation.
        vmem_limit_bytes = min(cfg.vmem_cap_bytes,
                               max(16 * _MiB, int(1.5 * ws) + 8 * _MiB))

    n_pad = pl.cdiv(n_rows, tm) * tm
    if n_pad != n_rows:
        x2d = jnp.pad(x2d, ((0, n_pad - n_rows), (0, 0)))

    grid = (n_pad // tm, i_pad // tk)
    scratch_shapes = [pltpu.VMEM((tm, hidden), jnp.float32)] if need_acc else []

    out = pl.pallas_call(
        functools.partial(_gemma_mlp_kernel, tk=tk),
        out_shape=jax.ShapeDtypeStruct((n_pad, hidden), out_dtype),
        grid_spec=pltpu.PrefetchScalarGridSpec(
            num_scalar_prefetch=0,
            grid=grid,
            in_specs=[
                pl.BlockSpec((tm, hidden), lambda i, k: (i, 0)),      # x (resident over k)
                pl.BlockSpec((hidden, 2 * tk), lambda i, k: (0, k)),  # fused gate|up tile
                pl.BlockSpec((tk, hidden), lambda i, k: (k, 0)),      # down-proj tile
            ],
            out_specs=pl.BlockSpec((tm, hidden), lambda i, k: (i, 0)),
            scratch_shapes=scratch_shapes,
        ),
        compiler_params=pltpu.CompilerParams(
            dimension_semantics=("parallel", "arbitrary"),
            vmem_limit_bytes=vmem_limit_bytes,
        ),
    )(x2d, wgu, wd)

    if n_pad != n_rows:
        out = out[:n_rows]
    return out.reshape(orig_shape)


def gemma_mlp_ref(x, gate_w, up_w, down_w):
    xf = x.astype(jnp.float32)
    gate = xf @ gate_w.astype(jnp.float32).T
    up = xf @ up_w.astype(jnp.float32).T
    h = _gelu_tanh(gate) * up
    y = h @ down_w.astype(jnp.float32).T
    return y.astype(x.dtype)


if __name__ == "__main__":
    key = jax.random.PRNGKey(0)
    batch, seq, hidden, inter = 2, 8, 32, 64

    kx, kg, ku, kd = jax.random.split(key, 4)
    x = jax.random.normal(kx, (batch, seq, hidden), dtype=jnp.float32)
    gate_w = jax.random.normal(kg, (inter, hidden), dtype=jnp.float32) / (hidden ** 0.5)
    up_w = jax.random.normal(ku, (inter, hidden), dtype=jnp.float32) / (hidden ** 0.5)
    down_w = jax.random.normal(kd, (hidden, inter), dtype=jnp.float32) / (inter ** 0.5)

    # f32 path (accumulates directly into the resident output block, no scratch).
    prep = prepare_gemma_mlp_weights(gate_w, up_w, down_w)
    out = jax.block_until_ready(gemma_mlp(x, prep))
    ref = gemma_mlp_ref(x, gate_w, up_w, down_w)
    assert out.shape == x.shape and out.dtype == x.dtype
    max_err = float(jnp.max(jnp.abs(out - ref)))
    assert jnp.allclose(out, ref, atol=1e-2, rtol=1e-2), f"f32 mismatch, max_err={max_err}"

    # bf16 path (production config: bf16 weights/activations, f32 VMEM accumulator).
    xb = x.astype(jnp.bfloat16)
    prep_b = prepare_gemma_mlp_weights(gate_w, up_w, down_w, dtype=jnp.bfloat16)
    out_b = jax.block_until_ready(gemma_mlp(xb, prep_b))
    ref_b = gemma_mlp_ref(xb, gate_w.astype(jnp.bfloat16), up_w.astype(jnp.bfloat16),
                          down_w.astype(jnp.bfloat16)).astype(jnp.float32)
    assert out_b.shape == xb.shape and out_b.dtype == xb.dtype
    max_err_b = float(jnp.max(jnp.abs(out_b.astype(jnp.float32) - ref_b)))
    assert max_err_b < 0.1, f"bf16 mismatch, max_err={max_err_b}"

    print("KERNEL_OK")
</pallas_src>

<mosaic_0001>
module attributes {stable_mosaic.version = 11 : i64} {
  func.func @_gemma_mlp_kernel(%arg0: i32, %arg1: i32, %arg2: memref<16x32xf32, #tpu.memory_space<vmem>>, %arg3: memref<32x128xf32, #tpu.memory_space<vmem>>, %arg4: memref<64x32xf32, #tpu.memory_space<vmem>>, %arg5: memref<16x32xf32, #tpu.memory_space<vmem>>) attributes {dimension_semantics = [#tpu.dimension_semantics<parallel>, #tpu.dimension_semantics<arbitrary>], iteration_bounds = array<i64: 1, 1>, scalar_prefetch = 0 : i64, scratch_operands = 0 : i64, tpu.core_type = #tpu.core_type<tc>, window_params = [{transform_indices = @transform_0, window_bounds = array<i64: 16, 32>}, {transform_indices = @transform_1, window_bounds = array<i64: 32, 128>}, {transform_indices = @transform_2, window_bounds = array<i64: 64, 32>}, {transform_indices = @transform_3, window_bounds = array<i64: 16, 32>}]} {
    %c0_i32 = arith.constant 0 : i32
    %0 = arith.cmpi eq, %arg1, %c0_i32 : i32
    %1 = arith.extui %0 : i1 to i32
    %c0_i32_0 = arith.constant 0 : i32
    %2 = arith.cmpi ne, %1, %c0_i32_0 : i32
    scf.if %2 {
      %cst_15 = arith.constant 0.000000e+00 : f32
      %27 = vector.broadcast %cst_15 : f32 to vector<16x32xf32>
      %c0_16 = arith.constant 0 : index
      %c0_17 = arith.constant 0 : index
      %28 = vector.load %arg5[%c0_16, %c0_17] : memref<16x32xf32, #tpu.memory_space<vmem>>, vector<16x32xf32>
      tpu.vector_store %arg5[%c0_16, %c0_17], %27 {strides = array<i32>} : memref<16x32xf32, #tpu.memory_space<vmem>>, vector<16x32xf32>,
    } else {
    }
    %c0 = arith.constant 0 : index
    %c0_1 = arith.constant 0 : index
    %3 = vector.load %arg2[%c0, %c0_1] : memref<16x32xf32, #tpu.memory_space<vmem>>, vector<16x32xf32>
    %c0_2 = arith.constant 0 : index
    %c0_3 = arith.constant 0 : index
    %4 = vector.load %arg3[%c0_2, %c0_3] : memref<32x128xf32, #tpu.memory_space<vmem>>, vector<32x128xf32>
    %cst = arith.constant dense<0.000000e+00> : vector<16x128xf32>
    %5 = tpu.matmul %3, %4, %cst {dimension_numbers = #tpu.dot_dimension_numbers<[1], [0], [0], [1], [0, 0, 1, 1], [], []>} : vector<16x32xf32>, vector<32x128xf32>, vector<16x128xf32> -> vector<16x128xf32>
    %6 = vector.extract_strided_slice %5 {offsets = [0, 0], sizes = [16, 64], strides = [1, 1]} : vector<16x128xf32> to vector<16x64xf32>
    %7 = vector.extract_strided_slice %5 {offsets = [0, 64], sizes = [16, 64], strides = [1, 1]} : vector<16x128xf32> to vector<16x64xf32>
    %cst_4 = arith.constant 5.000000e-01 : f32
    %8 = vector.broadcast %cst_4 : f32 to vector<16x64xf32>
    %9 = arith.mulf %8, %6 : vector<16x64xf32>
    %10 = arith.mulf %6, %6 : vector<16x64xf32>
    %11 = arith.mulf %10, %6 : vector<16x64xf32>
    %cst_5 = arith.constant 4.471500e-02 : f32
    %12 = vector.broadcast %cst_5 : f32 to vector<16x64xf32>
    %13 = arith.mulf %12, %11 : vector<16x64xf32>
    %14 = arith.addf %6, %13 : vector<16x64xf32>
    %cst_6 = arith.constant 0.797884583 : f32
    %15 = vector.broadcast %cst_6 : f32 to vector<16x64xf32>
    %16 = arith.mulf %15, %14 : vector<16x64xf32>
    %17 = math.tanh %16 : vector<16x64xf32>
    %cst_7 = arith.constant 1.000000e+00 : f32
    %18 = vector.broadcast %cst_7 : f32 to vector<16x64xf32>
    %19 = arith.addf %18, %17 : vector<16x64xf32>
    %20 = arith.mulf %9, %19 : vector<16x64xf32>
    %21 = arith.mulf %20, %7 : vector<16x64xf32>
    %c0_8 = arith.constant 0 : index
    %c0_9 = arith.constant 0 : index
    %22 = vector.load %arg5[%c0_8, %c0_9] : memref<16x32xf32, #tpu.memory_space<vmem>>, vector<16x32xf32>
    %c0_10 = arith.constant 0 : index
    %c0_11 = arith.constant 0 : index
    %23 = vector.load %arg4[%c0_10, %c0_11] : memref<64x32xf32, #tpu.memory_space<vmem>>, vector<64x32xf32>
    %cst_12 = arith.constant dense<0.000000e+00> : vector<16x32xf32>
    %24 = tpu.matmul %21, %23, %cst_12 {dimension_numbers = #tpu.dot_dimension_numbers<[1], [0], [0], [1], [0, 0, 1, 1], [], []>} : vector<16x64xf32>, vector<64x32xf32>, vector<16x32xf32> -> vector<16x32xf32>
    %25 = arith.addf %22, %24 : vector<16x32xf32>
    %c0_13 = arith.constant 0 : index
    %c0_14 = arith.constant 0 : index
    %26 = vector.load %arg5[%c0_13, %c0_14] : memref<16x32xf32, #tpu.memory_space<vmem>>, vector<16x32xf32>
    tpu.vector_store %arg5[%c0_13, %c0_14], %25 {strides = array<i32>} : memref<16x32xf32, #tpu.memory_space<vmem>>, vector<16x32xf32>,
    return
  }
  func.func @transform_0(%arg0: i32, %arg1: i32) -> (i32, i32) {
    %c0_i32 = arith.constant 0 : i32
    %c0_i32_0 = arith.constant 0 : i32
    return %arg0, %c0_i32 : i32, i32
  }
  func.func @transform_1(%arg0: i32, %arg1: i32) -> (i32, i32) {
    %c0_i32 = arith.constant 0 : i32
    %c0_i32_0 = arith.constant 0 : i32
    return %c0_i32, %arg1 : i32, i32
  }
  func.func @transform_2(%arg0: i32, %arg1: i32) -> (i32, i32) {
    %c0_i32 = arith.constant 0 : i32
    %c0_i32_0 = arith.constant 0 : i32
    return %arg1, %c0_i32 : i32, i32
  }
  func.func @transform_3(%arg0: i32, %arg1: i32) -> (i32, i32) {
    %c0_i32 = arith.constant 0 : i32
    %c0_i32_0 = arith.constant 0 : i32
    return %arg0, %c0_i32 : i32, i32
  }
}

</mosaic_0001>

<bundles_post_ra>
// kernel: tpu_custom_call.1
= control target key start
LH: loop header
LB: loop body
LE: loop exit
PB: predicated region body
PF: predicated region fallthrough
CT: control target
= control target key end

     0   :  { %s275_s0 = inlined_call_operand.vmem [shape: f32[16,32], index: 0, kind: input, shape index: {}]   ;;  %s276_s1 = inlined_call_operand.vmem [shape: f32[32,128], index: 1, kind: input, shape index: {}]   ;;  %s277_s2 = inlined_call_operand.vmem [shape: f32[64,32], index: 2, kind: input, shape index: {}]   ;;  %s278_s3 = inlined_call_operand.hbm [shape: f32[16,32], index: 3, kind: output, shape index: {}]  }
   0x1   :  { %v27_v0 = vld [vmem:[%s276_s1 + $0x18] sm:$0xff]  ;;  %v26_v1 = vld [vmem:[%s276_s1 + $0x10] sm:$0xff]  ;;  %v25_v2 = vld [vmem:[%s276_s1 + $0x8] sm:$0xff] }
   0x2   :  { %47 = vmatpush.msra.mxu0 %v27_v0  ;;  %152 = vmatpush.msra.mxu3 %v27_v0 }
   0x3   :  { %8 = vsyncpa [#allocation3], 0  ;;  %v24_v3 = vld [vmem:[%s276_s1] sm:$0xff]  ;;  %vm19_vm0 = vcmask 261120   ;;  %v23_v5 = vld [vmem:[%s275_s0 + $0x8] sm:$0xff]  ;;  %s199_s9 = smov 64  }
   0x4   :  { %48 = vmatpush.msra.mxu0 %v26_v1  ;;  %153 = vmatpush.msra.mxu3 %v26_v1  ;;  %v22_v4 = vld [vmem:[%s275_s0] sm:$0xff]  ;;  %v95_v6 = vld [vmem:[%s277_s2 + $0x38] sm:$0xff]  ;;  %v94_v7 = vld [vmem:[%s277_s2 + $0x30] sm:$0xff]  ;;  %v200_v22 = vmov 0.0   ;;  %vm96_vm1 = vcmask 523264   ;;  %s136_s15 = sshll.u32 %s278_s3, 4  ;;  %s137_s15 = int_to_ptr.hbm [resolvable:$true] %s136_s15 }
   0x5   :  { %156 = vmatpush.msra.mxu2 %v95_v6  ;;  %111 = vmatpush.msra.mxu1 %v95_v6  ;;  %v93_v8 = vld [vmem:[%s277_s2 + $0x28] sm:$0xff]  ;;  %v92_v9 = vld [vmem:[%s277_s2 + $0x20] sm:$0xff]  ;;  %v91_v10 = vld [vmem:[%s277_s2 + $0x18] sm:$0xff]  ;;  %21 = vst.msk [vmem:[#allocation2 + $0x8] sm:$0xff] %vm19_vm0, %v200_v22  ;;  %s202_s16 = smov 128   ;;  %s203_s17 = smov 8  }
   0x6   :  { %49 = vmatpush.msra.mxu0 %v25_v2  ;;  %154 = vmatpush.msra.mxu3 %v25_v2  ;;  %v90_v11 = vld [vmem:[%s277_s2 + $0x10] sm:$0xff]  ;;  %v89_v12 = vld [vmem:[%s277_s2 + $0x8] sm:$0xff]  ;;  %v88_v16 = vld [vmem:[%s277_s2] sm:$0xff]  ;;  %20 = vst.msk [vmem:[#allocation2] sm:$0xff] %vm19_vm0, %v200_v22  ;;  %s201_s2 = smov [#allocation2]  }
   0x7   :  { %157 = vmatpush.msra.mxu2 %v94_v7  ;;  %112 = vmatpush.msra.mxu1 %v94_v7  ;;  %s134_s12 = sshll.u32 %s201_s2, 4  ;;  %s135_s12 = int_to_ptr.vmem [resolvable:$true] %s134_s12 }
   0x8   :  { %50 = vmatpush.msra.mxu0 %v24_v3  ;;  %155 = vmatpush.msra.mxu3 %v24_v3 }
   0x9   :  { %148 = vmatmul.msk.f32.vlgmr.msra.gmra.mxu0 %vm19_vm0, %v22_v4  ;;  %149 = vmatmul.msk.f32.vlgmr.msra.gmra.mxu3 %vm19_vm0, %v23_v5 }
   0xa   :  { %158 = vmatpush.msra.mxu2 %v93_v8  ;;  %113 = vmatpush.msra.mxu1 %v93_v8 }
   0xc   :  { %159 = vmatpush.msra.mxu2 %v92_v9  ;;  %114 = vmatpush.msra.mxu1 %v92_v9  ;;  %v87_v39 = vld [vmem:[#allocation2 + $0x8] sm:$0xff] }
   0xd   :  { %v86_v41 = vld [vmem:[#allocation2] sm:$0xff] }
   0xe   :  { %160 = vmatpush.msra.mxu2 %v91_v10  ;;  %115 = vmatpush.msra.mxu1 %v91_v10 }
  0x10   :  { %161 = vmatpush.msra.mxu2 %v90_v11  ;;  %116 = vmatpush.msra.mxu1 %v90_v11 }
  0x12   :  { %162 = vmatpush.msra.mxu2 %v89_v12  ;;  %117 = vmatpush.msra.mxu1 %v89_v12 }
  0x14   :  { %163 = vmatpush.msra.mxu2 %v88_v16  ;;  %118 = vmatpush.msra.mxu1 %v88_v16 }
  0x86   :  { %v52_v14 = vpop.f32.mrf.mxu0 }
  0x87   :  { %v60_v18 = vmul.f32 %v52_v14, %v52_v14  ;;  %v58_v35 = vmul.f32 0.5, %v52_v14 }
  0x89   :  { %v62_v20 = vmul.f32 %v60_v18, %v52_v14 }
  0x8b   :  { %v64_v23 = vmul.f32 0.044715, %v62_v20 }
  0x8c   :  { %v55_v13 = vpop.f32.mrf.mxu3 }
  0x8d   :  { %80 = vrot.lane.b32.xlu0 %v55_v13, %s199_s9  ;;  %v61_v15 = vmul.f32 %v55_v13, %v55_v13  ;;  %v66_v25 = vadd.f32 %v64_v23, %v52_v14  ;;  %v59_v29 = vmul.f32 0.5, %v55_v13 }
  0x8f   :  { %v63_v17 = vmul.f32 %v61_v15, %v55_v13  ;;  %v68_v26 = vmul.f32 0.7978846, %v66_v25 }
  0x91   :  { %v65_v19 = vmul.f32 0.044715, %v63_v17 }
  0x93   :  { %v67_v21 = vadd.f32 %v65_v19, %v55_v13 }
  0x95   :  { %78 = vrot.lane.b32.xlu0 %v52_v14, %s199_s9  ;;  %v69_v24 = vmul.f32 0.7978846, %v67_v21 }
  0x97   :  { %169 = vtanh.f32 %v69_v24 }
  0x98   :  { %171 = vtanh.f32 %v68_v26 }
  0x9d   :  { %v170_v27 = vpop.eup %169 }
  0x9e   :  { %v73_v28 = vadd.f32 1.0, %v170_v27  ;;  %v172_v31 = vpop.eup %171 }
  0x9f   :  { %v72_v34 = vadd.f32 1.0, %v172_v31 }
  0xa0   :  { %v75_v30 = vmul.f32 %v73_v28, %v59_v29 }
  0xa1   :  { %v74_v36 = vmul.f32 %v72_v34, %v58_v35 }
  0xff   :  { %v81_v32 = vpop.permute.xlu0 %80 }
 0x100   :  { %v85_v33 = vmul.f32 %v81_v32, %v75_v30 }
 0x102   :  { %151 = vmatmul.msk.f32.vlgmr.msra.gmra.mxu2 %vm96_vm1, %v85_v33 }
 0x107   :  { %v79_v37 = vpop.permute.xlu0 %78 }
 0x108   :  { %v84_v38 = vmul.f32 %v79_v37, %v74_v36 }
 0x10a   :  { %150 = vmatmul.msk.f32.vlgmr.msra.gmra.mxu1 %vm96_vm1, %v84_v38 }
 0x185   :  { %v123_v40 = vpop.f32.mrf.mxu2 }
 0x186   :  { %v127_v42 = vadd.f32 %v123_v40, %v87_v39 }
 0x187   :  { %v120_v43 = vpop.f32.mrf.mxu1 }
 0x188   :  { %129 = vst.msk [vmem:[#allocation2 + $0x8] sm:$0xff] %vm19_vm0, %v127_v42  ;;  %v126_v44 = vadd.f32 %v120_v43, %v86_v41 }
 0x18a   :  { %128 = vst.msk [vmem:[#allocation2] sm:$0xff] %vm19_vm0, %v126_v44 }
 0x18b   :  { %142 = dma.vmem_to_hbm [thread:$0]  %s135_s12, 256, %s137_s15, [#allocation3], %s202_s16, %s202_s16, %s203_s17  }
 0x18c   :  { %197 = dma.done.wait [#allocation3], 256  }
 0x18d   :  { %198 = vsyncadd [#allocation3], 4294967040 }
 0x18e   :  { %147 = vsyncpa [#allocation3], 1 }

</bundles_post_ra>
